<compile_context>
chip_gen: v7x
topology: tpu7x:2x2x1
jax: 0.10.0
libtpu: 0.0.40
codegen_flags: <defaults>
</compile_context>

<pallas_src>
import functools

import jax
import jax.numpy as jnp
from jax import lax
from jax.experimental import pallas as pl
from jax.experimental.pallas import tpu as pltpu

EPS = 1e-5


def _bn_per_view(x, batch, gamma=None, beta=None):
    """Per-view BatchNorm1d (training-mode batch stats, biased variance) on a
    [2B, D] tensor holding view1 rows [0:B] and view2 rows [B:2B].

    Uses a leading-dim reshape to (2, B, D) (layout-preserving; B is a multiple
    of the 8-row sublane tile) rather than slice + jnp.concatenate, so no VMEM
    copies are materialized."""
    d = x.shape[-1]
    xv = x.reshape(2, batch, d)
    mean = jnp.mean(xv, axis=1, keepdims=True)
    var = jnp.mean((xv - mean) ** 2, axis=1, keepdims=True)
    y = (xv - mean) * lax.rsqrt(var + EPS)
    if gamma is not None:
        y = y * gamma + beta                      # (1, D) broadcasts over (2, B, D)
    return y.reshape(2 * batch, d)


def barlow_twins_kernel(x1_ref, x2_ref, wb_ref,
                        w1_ref, g1_ref, b1_ref,
                        w2_ref, g2_ref, b2_ref,
                        w3_ref,
                        loss_ref,
                        feat_acc,
                        *, batch, lambd, k_rem):
    k = pl.program_id(0)
    nk = pl.num_programs(0)

    @pl.when(k == 0)
    def _init():
        feat_acc[...] = jnp.zeros_like(feat_acc)

    # ---- Backbone matmul, K-tiled over the grid.  bf16 tiles go straight to
    # the MXU; the wb tile is loaded once per K-step and reused by both views.
    x1 = x1_ref[...]
    x2 = x2_ref[...]
    wb = wb_ref[...]
    tk = x1.shape[1]

    if k_rem:
        # Ragged last K-tile: zero the out-of-bounds tail in-kernel instead of
        # padding x / wb in the wrapper (avoids an extra HBM pass over them).
        limit = jnp.where(k == nk - 1, k_rem, tk)
        cmask = lax.broadcasted_iota(jnp.int32, (1, tk), 1) < limit   # x columns
        rmask = lax.broadcasted_iota(jnp.int32, (tk, 1), 0) < limit   # wb rows
        x1 = jnp.where(cmask, x1, jnp.zeros_like(x1))
        x2 = jnp.where(cmask, x2, jnp.zeros_like(x2))
        wb = jnp.where(rmask, wb, jnp.zeros_like(wb))

    feat_acc[0:batch, :] += jnp.dot(x1, wb, preferred_element_type=jnp.float32)
    feat_acc[batch:2 * batch, :] += jnp.dot(x2, wb,
                                            preferred_element_type=jnp.float32)

    # ---- Epilogue: projector + per-view BN + cross-correlation + fused loss.
    @pl.when(k == nk - 1)
    def _finish():
        f = feat_acc[...]                                   # (2B, 64) f32

        h = jnp.dot(f, w1_ref[...], preferred_element_type=jnp.float32)
        h = jnp.maximum(_bn_per_view(h, batch, g1_ref[...], b1_ref[...]), 0.0)
        h = jnp.dot(h, w2_ref[...], preferred_element_type=jnp.float32)
        h = jnp.maximum(_bn_per_view(h, batch, g2_ref[...], b2_ref[...]), 0.0)
        z = jnp.dot(h, w3_ref[...], preferred_element_type=jnp.float32)

        # Final affine-free BatchNorm, per view.
        zn = _bn_per_view(z, batch)
        z1n = zn[:batch]
        z2n = zn[batch:]

        # c = z1n.T @ z2n / B : contract over the batch dim directly.
        c = lax.dot_general(
            z1n, z2n, dimension_numbers=(((0,), (0,)), ((), ())),
            preferred_element_type=jnp.float32) * (1.0 / batch)

        d = c.shape[0]
        row = lax.broadcasted_iota(jnp.int32, (d, d), 0)
        col = lax.broadcasted_iota(jnp.int32, (d, d), 1)
        eye = (row == col).astype(jnp.float32)
        # Fused BT loss: diag -> (c_ii - 1)^2, off-diag -> lambd * c_ij^2.
        wmat = eye + lambd * (1.0 - eye)
        loss_ref[0, 0] = jnp.sum(((c - eye) ** 2) * wmat)


def barlow_twins_loss(y1, y2, params, *, lambd, block_k=2048):
    wb, w1, g1, b1, w2, g2, b2, w3 = params
    B = y1.shape[0]

    # Flatten only (metadata reshape, no HBM copy).  Keep the caller's dtype:
    # bf16 activations + backbone weight feed the MXU natively (f32 accumulate).
    x1 = y1.reshape(B, -1)
    x2 = y2.reshape(B, -1)
    K = x1.shape[1]
    feat_dim = wb.shape[1]

    # K tiling: lane-aligned tiles; the ragged tail (if any) is masked in-kernel
    # so neither x nor wb is ever padded/copied in the wrapper.
    block_k = max(128, (block_k // 128) * 128)
    tk = K if K <= block_k else block_k
    nk = pl.cdiv(K, tk)
    k_rem = K % tk

    kernel = functools.partial(barlow_twins_kernel, batch=B,
                               lambd=float(lambd), k_rem=k_rem)

    def whole(arr):
        # Whole-array resident block (constant index map => no re-DMA per step).
        return pl.BlockSpec(arr.shape, lambda k, _nd=arr.ndim: (0,) * _nd)

    # Note: if the wb DMA shows exposed latency at very large K, add
    # pipeline_mode=pl.Buffered(3) on the wb BlockSpec only (not on x).
    loss = pl.pallas_call(
        kernel,
        out_shape=jax.ShapeDtypeStruct((1, 1), jnp.float32),
        grid_spec=pltpu.PrefetchScalarGridSpec(
            num_scalar_prefetch=0,
            grid=(nk,),
            in_specs=[
                pl.BlockSpec((B, tk), lambda k: (0, k)),          # view 1
                pl.BlockSpec((B, tk), lambda k: (0, k)),          # view 2
                pl.BlockSpec((tk, feat_dim), lambda k: (k, 0)),   # backbone weight
                whole(w1), whole(g1), whole(b1),
                whole(w2), whole(g2), whole(b2),
                whole(w3),
            ],
            # Scalar loss lives in SMEM (a (1,1) VMEM block would pad to an
            # (8,128) tile and store through a masked vst).
            out_specs=pl.BlockSpec(memory_space=pltpu.MemorySpace.SMEM),
            scratch_shapes=[pltpu.VMEM((2 * B, feat_dim), jnp.float32)],
        ),
        compiler_params=pltpu.CompilerParams(
            dimension_semantics=("arbitrary",),
            # v7x-safe budget (64 MiB physical there); v5e's 16 MiB scoped
            # default is overridden.  Actual tile use at tk=2048/bf16 is <1 MiB.
            vmem_limit_bytes=48 * 1024 * 1024,
        ),
    )(x1, x2, wb, w1, g1, b1, w2, g2, b2, w3)
    return loss[0, 0]


# ----------------------------------------------------------------------------
# Pure-JAX reference (same math, no Pallas) for a sanity check.
# ----------------------------------------------------------------------------
def _bn_ref(x, gamma=None, beta=None):
    mean = jnp.mean(x, axis=0, keepdims=True)
    var = jnp.mean((x - mean) ** 2, axis=0, keepdims=True)
    y = (x - mean) * lax.rsqrt(var + EPS)
    if gamma is not None:
        y = y * gamma + beta
    return y


def _reference_loss(y1, y2, params, *, lambd):
    wb, w1, g1, b1, w2, g2, b2, w3 = params
    B = y1.shape[0]
    wb32 = wb.astype(jnp.float32)

    def encode(x):
        f = x.reshape(B, -1).astype(jnp.float32) @ wb32
        h = jnp.maximum(_bn_ref(f @ w1, g1, b1), 0.0)
        h = jnp.maximum(_bn_ref(h @ w2, g2, b2), 0.0)
        return h @ w3

    z1n = _bn_ref(encode(y1))
    z2n = _bn_ref(encode(y2))
    c = (z1n.T @ z2n) / B
    on_diag = jnp.sum((jnp.diag(c) - 1.0) ** 2)
    off_diag = jnp.sum(c ** 2) - jnp.sum(jnp.diag(c) ** 2)
    return on_diag + lambd * off_diag


def init_params(key, in_dim, feat_dim=64, hidden=32, out_dim=32):
    ks = jax.random.split(key, 4)
    scale = 0.05
    # Backbone weight stored in bf16 (dominant HBM stream); projector weights
    # and BN affine params stay f32 (tiny, resident in VMEM).
    wb = (scale * jax.random.normal(ks[0], (in_dim, feat_dim), jnp.float32)
          ).astype(jnp.bfloat16)
    w1 = scale * jax.random.normal(ks[1], (feat_dim, hidden), jnp.float32)
    w2 = scale * jax.random.normal(ks[2], (hidden, hidden), jnp.float32)
    w3 = scale * jax.random.normal(ks[3], (hidden, out_dim), jnp.float32)
    g1 = jnp.ones((1, hidden), jnp.float32)
    b1 = jnp.zeros((1, hidden), jnp.float32)
    g2 = jnp.ones((1, hidden), jnp.float32)
    b2 = jnp.zeros((1, hidden), jnp.float32)
    return (wb, w1, g1, b1, w2, g2, b2, w3)


if __name__ == "__main__":
    B, C, H, W = 8, 4, 16, 16
    lambd = 0.005  # args.lambd
    key = jax.random.PRNGKey(0)
    k1, k2, kp = jax.random.split(key, 3)

    # bf16 views: native MXU operands, half the HBM bytes on the big streams.
    y1 = jax.random.normal(k1, (B, C, H, W), jnp.float32).astype(jnp.bfloat16)
    y2 = jax.random.normal(k2, (B, C, H, W), jnp.float32).astype(jnp.bfloat16)
    params = init_params(kp, C * H * W)

    loss = jax.block_until_ready(barlow_twins_loss(y1, y2, params, lambd=lambd))
    ref = jax.block_until_ready(_reference_loss(y1, y2, params, lambd=lambd))

    assert jnp.isfinite(loss), "loss is not finite"
    tol = 2e-3 * max(1.0, abs(float(ref)))
    assert abs(float(loss) - float(ref)) < tol, (
        f"mismatch: pallas={float(loss)} ref={float(ref)}")

    # Also exercise the ragged-K path (K=1024, tk=384 -> in-kernel tail mask).
    loss_ragged = jax.block_until_ready(
        barlow_twins_loss(y1, y2, params, lambd=lambd, block_k=384))
    assert abs(float(loss_ragged) - float(ref)) < tol, (
        f"ragged mismatch: pallas={float(loss_ragged)} ref={float(ref)}")

    print("KERNEL_OK")
</pallas_src>

<mosaic_0001>
module attributes {stable_mosaic.version = 11 : i64} {
  func.func @barlow_twins_kernel(%arg0: i32, %arg1: memref<8x1024xbf16, #tpu.memory_space<vmem>>, %arg2: memref<8x1024xbf16, #tpu.memory_space<vmem>>, %arg3: memref<1024x64xbf16, #tpu.memory_space<vmem>>, %arg4: memref<64x32xf32, #tpu.memory_space<vmem>>, %arg5: memref<1x32xf32, #tpu.memory_space<vmem>>, %arg6: memref<1x32xf32, #tpu.memory_space<vmem>>, %arg7: memref<32x32xf32, #tpu.memory_space<vmem>>, %arg8: memref<1x32xf32, #tpu.memory_space<vmem>>, %arg9: memref<1x32xf32, #tpu.memory_space<vmem>>, %arg10: memref<32x32xf32, #tpu.memory_space<vmem>>, %arg11: memref<1x1xf32, #tpu.memory_space<smem>>, %arg12: memref<16x64xf32, #tpu.memory_space<vmem>>) attributes {dimension_semantics = [#tpu.dimension_semantics<arbitrary>], iteration_bounds = array<i64: 1>, scalar_prefetch = 0 : i64, scratch_operands = 1 : i64, tpu.core_type = #tpu.core_type<tc>, window_params = [{transform_indices = @transform_0, window_bounds = array<i64: 8, 1024>}, {transform_indices = @transform_1, window_bounds = array<i64: 8, 1024>}, {transform_indices = @transform_2, window_bounds = array<i64: 1024, 64>}, {pipeline_mode = #tpu.pipeline_mode<synchronous>, transform_indices = @transform_3, window_bounds = array<i64: 64, 32>}, {pipeline_mode = #tpu.pipeline_mode<synchronous>, transform_indices = @transform_4, window_bounds = array<i64: 1, 32>}, {pipeline_mode = #tpu.pipeline_mode<synchronous>, transform_indices = @transform_5, window_bounds = array<i64: 1, 32>}, {pipeline_mode = #tpu.pipeline_mode<synchronous>, transform_indices = @transform_6, window_bounds = array<i64: 32, 32>}, {pipeline_mode = #tpu.pipeline_mode<synchronous>, transform_indices = @transform_7, window_bounds = array<i64: 1, 32>}, {pipeline_mode = #tpu.pipeline_mode<synchronous>, transform_indices = @transform_8, window_bounds = array<i64: 1, 32>}, {pipeline_mode = #tpu.pipeline_mode<synchronous>, transform_indices = @transform_9, window_bounds = array<i64: 32, 32>}, {transform_indices = @transform_10, window_bounds = array<i64: 1, 1>}]} {
    %c0_i32 = arith.constant 0 : i32
    %0 = arith.cmpi eq, %arg0, %c0_i32 : i32
    %1 = arith.extui %0 : i1 to i32
    %c0_i32_0 = arith.constant 0 : i32
    %2 = arith.cmpi ne, %1, %c0_i32_0 : i32
    scf.if %2 {
      %cst_16 = arith.constant 0.000000e+00 : f32
      %17 = vector.broadcast %cst_16 : f32 to vector<16x64xf32>
      %c0_17 = arith.constant 0 : index
      %c0_18 = arith.constant 0 : index
      %18 = vector.load %arg12[%c0_17, %c0_18] : memref<16x64xf32, #tpu.memory_space<vmem>>, vector<16x64xf32>
      tpu.vector_store %arg12[%c0_17, %c0_18], %17 {strides = array<i32>} : memref<16x64xf32, #tpu.memory_space<vmem>>, vector<16x64xf32>,
    } else {
    }
    %c0 = arith.constant 0 : index
    %c0_1 = arith.constant 0 : index
    %3 = vector.load %arg1[%c0, %c0_1] : memref<8x1024xbf16, #tpu.memory_space<vmem>>, vector<8x1024xbf16>
    %c0_2 = arith.constant 0 : index
    %c0_3 = arith.constant 0 : index
    %4 = vector.load %arg2[%c0_2, %c0_3] : memref<8x1024xbf16, #tpu.memory_space<vmem>>, vector<8x1024xbf16>
    %c0_4 = arith.constant 0 : index
    %c0_5 = arith.constant 0 : index
    %5 = vector.load %arg3[%c0_4, %c0_5] : memref<1024x64xbf16, #tpu.memory_space<vmem>>, vector<1024x64xbf16>
    %c0_6 = arith.constant 0 : index
    %c0_7 = arith.constant 0 : index
    %6 = vector.load %arg12[%c0_6, %c0_7] : memref<16x64xf32, #tpu.memory_space<vmem>>, vector<8x64xf32>
    %cst = arith.constant dense<0.000000e+00> : vector<8x64xf32>
    %7 = tpu.matmul %3, %5, %cst {dimension_numbers = #tpu.dot_dimension_numbers<[1], [0], [0], [1], [0, 0, 1, 1], [], []>} : vector<8x1024xbf16>, vector<1024x64xbf16>, vector<8x64xf32> -> vector<8x64xf32>
    %8 = arith.addf %6, %7 : vector<8x64xf32>
    %c0_8 = arith.constant 0 : index
    %c0_9 = arith.constant 0 : index
    %9 = vector.load %arg12[%c0_8, %c0_9] : memref<16x64xf32, #tpu.memory_space<vmem>>, vector<8x64xf32>
    tpu.vector_store %arg12[%c0_8, %c0_9], %8 {strides = array<i32>} : memref<16x64xf32, #tpu.memory_space<vmem>>, vector<8x64xf32>,
    %c8 = arith.constant 8 : index
    %c0_10 = arith.constant 0 : index
    %10 = vector.load %arg12[%c8, %c0_10] : memref<16x64xf32, #tpu.memory_space<vmem>>, vector<8x64xf32>
    %cst_11 = arith.constant dense<0.000000e+00> : vector<8x64xf32>
    %11 = tpu.matmul %4, %5, %cst_11 {dimension_numbers = #tpu.dot_dimension_numbers<[1], [0], [0], [1], [0, 0, 1, 1], [], []>} : vector<8x1024xbf16>, vector<1024x64xbf16>, vector<8x64xf32> -> vector<8x64xf32>
    %12 = arith.addf %10, %11 : vector<8x64xf32>
    %c8_12 = arith.constant 8 : index
    %c0_13 = arith.constant 0 : index
    %13 = vector.load %arg12[%c8_12, %c0_13] : memref<16x64xf32, #tpu.memory_space<vmem>>, vector<8x64xf32>
    tpu.vector_store %arg12[%c8_12, %c0_13], %12 {strides = array<i32>} : memref<16x64xf32, #tpu.memory_space<vmem>>, vector<8x64xf32>,
    %c0_i32_14 = arith.constant 0 : i32
    %14 = arith.cmpi eq, %arg0, %c0_i32_14 : i32
    %15 = arith.extui %14 : i1 to i32
    %c0_i32_15 = arith.constant 0 : i32
    %16 = arith.cmpi ne, %15, %c0_i32_15 : i32
    scf.if %16 {
      %c0_16 = arith.constant 0 : index
      %c0_17 = arith.constant 0 : index
      %17 = vector.load %arg12[%c0_16, %c0_17] : memref<16x64xf32, #tpu.memory_space<vmem>>, vector<16x64xf32>
      %c0_18 = arith.constant 0 : index
      %c0_19 = arith.constant 0 : index
      %18 = vector.load %arg4[%c0_18, %c0_19] : memref<64x32xf32, #tpu.memory_space<vmem>>, vector<64x32xf32>
      %cst_20 = arith.constant dense<0.000000e+00> : vector<16x32xf32>
      %19 = tpu.matmul %17, %18, %cst_20 {dimension_numbers = #tpu.dot_dimension_numbers<[1], [0], [0], [1], [0, 0, 1, 1], [], []>} : vector<16x64xf32>, vector<64x32xf32>, vector<16x32xf32> -> vector<16x32xf32>
      %c0_21 = arith.constant 0 : index
      %c0_22 = arith.constant 0 : index
      %20 = vector.load %arg5[%c0_21, %c0_22] : memref<1x32xf32, #tpu.memory_space<vmem>>, vector<1x32xf32>
      %c0_23 = arith.constant 0 : index
      %c0_24 = arith.constant 0 : index
      %21 = vector.load %arg6[%c0_23, %c0_24] : memref<1x32xf32, #tpu.memory_space<vmem>>, vector<1x32xf32>
      %22 = vector.shape_cast %19 : vector<16x32xf32> to vector<2x8x32xf32>
      %cst_25 = arith.constant dense<0.000000e+00> : vector<2x32xf32>
      %23 = vector.multi_reduction <add>, %22, %cst_25 [1] : vector<2x8x32xf32> to vector<2x32xf32>
      %24 = vector.shape_cast %23 : vector<2x32xf32> to vector<2x1x32xf32>
      %cst_26 = arith.constant 8.000000e+00 : f32
      %25 = vector.broadcast %cst_26 : f32 to vector<2x1x32xf32>
      %26 = arith.divf %24, %25 : vector<2x1x32xf32>
      %27 = vector.broadcast %26 : vector<2x1x32xf32> to vector<2x8x32xf32>
      %28 = arith.subf %22, %27 : vector<2x8x32xf32>
      %29 = arith.mulf %28, %28 : vector<2x8x32xf32>
      %cst_27 = arith.constant dense<0.000000e+00> : vector<2x32xf32>
      %30 = vector.multi_reduction <add>, %29, %cst_27 [1] : vector<2x8x32xf32> to vector<2x32xf32>
      %31 = vector.shape_cast %30 : vector<2x32xf32> to vector<2x1x32xf32>
      %cst_28 = arith.constant 8.000000e+00 : f32
      %32 = vector.broadcast %cst_28 : f32 to vector<2x1x32xf32>
      %33 = arith.divf %31, %32 : vector<2x1x32xf32>
      %34 = vector.broadcast %26 : vector<2x1x32xf32> to vector<2x8x32xf32>
      %35 = arith.subf %22, %34 : vector<2x8x32xf32>
      %cst_29 = arith.constant 9.99999974E-6 : f32
      %36 = vector.broadcast %cst_29 : f32 to vector<2x1x32xf32>
      %37 = arith.addf %33, %36 : vector<2x1x32xf32>
      %38 = math.rsqrt %37 : vector<2x1x32xf32>
      %39 = vector.broadcast %38 : vector<2x1x32xf32> to vector<2x8x32xf32>
      %40 = arith.mulf %35, %39 : vector<2x8x32xf32>
      %41 = vector.shape_cast %20 : vector<1x32xf32> to vector<1x1x32xf32>
      %42 = vector.broadcast %41 : vector<1x1x32xf32> to vector<2x8x32xf32>
      %43 = arith.mulf %40, %42 : vector<2x8x32xf32>
      %44 = vector.shape_cast %21 : vector<1x32xf32> to vector<1x1x32xf32>
      %45 = vector.broadcast %44 : vector<1x1x32xf32> to vector<2x8x32xf32>
      %46 = arith.addf %43, %45 : vector<2x8x32xf32>
      %47 = vector.shape_cast %46 : vector<2x8x32xf32> to vector<16x32xf32>
      %cst_30 = arith.constant 0.000000e+00 : f32
      %48 = vector.broadcast %cst_30 : f32 to vector<16x32xf32>
      %49 = arith.maximumf %47, %48 : vector<16x32xf32>
      %c0_31 = arith.constant 0 : index
      %c0_32 = arith.constant 0 : index
      %50 = vector.load %arg7[%c0_31, %c0_32] : memref<32x32xf32, #tpu.memory_space<vmem>>, vector<32x32xf32>
      %cst_33 = arith.constant dense<0.000000e+00> : vector<16x32xf32>
      %51 = tpu.matmul %49, %50, %cst_33 {dimension_numbers = #tpu.dot_dimension_numbers<[1], [0], [0], [1], [0, 0, 1, 1], [], []>} : vector<16x32xf32>, vector<32x32xf32>, vector<16x32xf32> -> vector<16x32xf32>
      %c0_34 = arith.constant 0 : index
      %c0_35 = arith.constant 0 : index
      %52 = vector.load %arg8[%c0_34, %c0_35] : memref<1x32xf32, #tpu.memory_space<vmem>>, vector<1x32xf32>
      %c0_36 = arith.constant 0 : index
      %c0_37 = arith.constant 0 : index
      %53 = vector.load %arg9[%c0_36, %c0_37] : memref<1x32xf32, #tpu.memory_space<vmem>>, vector<1x32xf32>
      %54 = vector.shape_cast %51 : vector<16x32xf32> to vector<2x8x32xf32>
      %cst_38 = arith.constant dense<0.000000e+00> : vector<2x32xf32>
      %55 = vector.multi_reduction <add>, %54, %cst_38 [1] : vector<2x8x32xf32> to vector<2x32xf32>
      %56 = vector.shape_cast %55 : vector<2x32xf32> to vector<2x1x32xf32>
      %cst_39 = arith.constant 8.000000e+00 : f32
      %57 = vector.broadcast %cst_39 : f32 to vector<2x1x32xf32>
      %58 = arith.divf %56, %57 : vector<2x1x32xf32>
      %59 = vector.broadcast %58 : vector<2x1x32xf32> to vector<2x8x32xf32>
      %60 = arith.subf %54, %59 : vector<2x8x32xf32>
      %61 = arith.mulf %60, %60 : vector<2x8x32xf32>
      %cst_40 = arith.constant dense<0.000000e+00> : vector<2x32xf32>
      %62 = vector.multi_reduction <add>, %61, %cst_40 [1] : vector<2x8x32xf32> to vector<2x32xf32>
      %63 = vector.shape_cast %62 : vector<2x32xf32> to vector<2x1x32xf32>
      %cst_41 = arith.constant 8.000000e+00 : f32
      %64 = vector.broadcast %cst_41 : f32 to vector<2x1x32xf32>
      %65 = arith.divf %63, %64 : vector<2x1x32xf32>
      %66 = vector.broadcast %58 : vector<2x1x32xf32> to vector<2x8x32xf32>
      %67 = arith.subf %54, %66 : vector<2x8x32xf32>
      %cst_42 = arith.constant 9.99999974E-6 : f32
      %68 = vector.broadcast %cst_42 : f32 to vector<2x1x32xf32>
      %69 = arith.addf %65, %68 : vector<2x1x32xf32>
      %70 = math.rsqrt %69 : vector<2x1x32xf32>
      %71 = vector.broadcast %70 : vector<2x1x32xf32> to vector<2x8x32xf32>
      %72 = arith.mulf %67, %71 : vector<2x8x32xf32>
      %73 = vector.shape_cast %52 : vector<1x32xf32> to vector<1x1x32xf32>
      %74 = vector.broadcast %73 : vector<1x1x32xf32> to vector<2x8x32xf32>
      %75 = arith.mulf %72, %74 : vector<2x8x32xf32>
      %76 = vector.shape_cast %53 : vector<1x32xf32> to vector<1x1x32xf32>
      %77 = vector.broadcast %76 : vector<1x1x32xf32> to vector<2x8x32xf32>
      %78 = arith.addf %75, %77 : vector<2x8x32xf32>
      %79 = vector.shape_cast %78 : vector<2x8x32xf32> to vector<16x32xf32>
      %cst_43 = arith.constant 0.000000e+00 : f32
      %80 = vector.broadcast %cst_43 : f32 to vector<16x32xf32>
      %81 = arith.maximumf %79, %80 : vector<16x32xf32>
      %c0_44 = arith.constant 0 : index
      %c0_45 = arith.constant 0 : index
      %82 = vector.load %arg10[%c0_44, %c0_45] : memref<32x32xf32, #tpu.memory_space<vmem>>, vector<32x32xf32>
      %cst_46 = arith.constant dense<0.000000e+00> : vector<16x32xf32>
      %83 = tpu.matmul %81, %82, %cst_46 {dimension_numbers = #tpu.dot_dimension_numbers<[1], [0], [0], [1], [0, 0, 1, 1], [], []>} : vector<16x32xf32>, vector<32x32xf32>, vector<16x32xf32> -> vector<16x32xf32>
      %84 = vector.shape_cast %83 : vector<16x32xf32> to vector<2x8x32xf32>
      %cst_47 = arith.constant dense<0.000000e+00> : vector<2x32xf32>
      %85 = vector.multi_reduction <add>, %84, %cst_47 [1] : vector<2x8x32xf32> to vector<2x32xf32>
      %86 = vector.shape_cast %85 : vector<2x32xf32> to vector<2x1x32xf32>
      %cst_48 = arith.constant 8.000000e+00 : f32
      %87 = vector.broadcast %cst_48 : f32 to vector<2x1x32xf32>
      %88 = arith.divf %86, %87 : vector<2x1x32xf32>
      %89 = vector.broadcast %88 : vector<2x1x32xf32> to vector<2x8x32xf32>
      %90 = arith.subf %84, %89 : vector<2x8x32xf32>
      %91 = arith.mulf %90, %90 : vector<2x8x32xf32>
      %cst_49 = arith.constant dense<0.000000e+00> : vector<2x32xf32>
      %92 = vector.multi_reduction <add>, %91, %cst_49 [1] : vector<2x8x32xf32> to vector<2x32xf32>
      %93 = vector.shape_cast %92 : vector<2x32xf32> to vector<2x1x32xf32>
      %cst_50 = arith.constant 8.000000e+00 : f32
      %94 = vector.broadcast %cst_50 : f32 to vector<2x1x32xf32>
      %95 = arith.divf %93, %94 : vector<2x1x32xf32>
      %96 = vector.broadcast %88 : vector<2x1x32xf32> to vector<2x8x32xf32>
      %97 = arith.subf %84, %96 : vector<2x8x32xf32>
      %cst_51 = arith.constant 9.99999974E-6 : f32
      %98 = vector.broadcast %cst_51 : f32 to vector<2x1x32xf32>
      %99 = arith.addf %95, %98 : vector<2x1x32xf32>
      %100 = math.rsqrt %99 : vector<2x1x32xf32>
      %101 = vector.broadcast %100 : vector<2x1x32xf32> to vector<2x8x32xf32>
      %102 = arith.mulf %97, %101 : vector<2x8x32xf32>
      %103 = vector.shape_cast %102 : vector<2x8x32xf32> to vector<16x32xf32>
      %104 = vector.extract_strided_slice %103 {offsets = [0, 0], sizes = [8, 32], strides = [1, 1]} : vector<16x32xf32> to vector<8x32xf32>
      %105 = vector.extract_strided_slice %103 {offsets = [8, 0], sizes = [8, 32], strides = [1, 1]} : vector<16x32xf32> to vector<8x32xf32>
      %cst_52 = arith.constant dense<0.000000e+00> : vector<32x32xf32>
      %106 = tpu.matmul %104, %105, %cst_52 {dimension_numbers = #tpu.dot_dimension_numbers<[0], [0], [1], [1], [0, 1, 1, 1], [], []>} : vector<8x32xf32>, vector<8x32xf32>, vector<32x32xf32> -> vector<32x32xf32>
      %cst_53 = arith.constant 1.250000e-01 : f32
      %107 = vector.broadcast %cst_53 : f32 to vector<32x32xf32>
      %108 = arith.mulf %106, %107 : vector<32x32xf32>
      %109 = tpu.iota {dimensions = array<i32: 0>} : vector<32x32xi32>
      %110 = tpu.iota {dimensions = array<i32: 1>} : vector<32x32xi32>
      %111 = arith.cmpi eq, %109, %110 : vector<32x32xi32>
      %112 = arith.extui %111 : vector<32x32xi1> to vector<32x32xi32>
      %113 = arith.sitofp %112 : vector<32x32xi32> to vector<32x32xf32>
      %cst_54 = arith.constant 1.000000e+00 : f32
      %114 = vector.broadcast %cst_54 : f32 to vector<32x32xf32>
      %115 = arith.subf %114, %113 : vector<32x32xf32>
      %cst_55 = arith.constant 5.000000e-03 : f32
      %116 = vector.broadcast %cst_55 : f32 to vector<32x32xf32>
      %117 = arith.mulf %116, %115 : vector<32x32xf32>
      %118 = arith.addf %113, %117 : vector<32x32xf32>
      %119 = arith.subf %108, %113 : vector<32x32xf32>
      %120 = arith.mulf %119, %119 : vector<32x32xf32>
      %121 = arith.mulf %120, %118 : vector<32x32xf32>
      %122 = vector.shape_cast %121 : vector<32x32xf32> to vector<1x32x32xf32>
      %cst_56 = arith.constant dense<0.000000e+00> : vector<1xf32>
      %123 = vector.multi_reduction <add>, %122, %cst_56 [1, 2] : vector<1x32x32xf32> to vector<1xf32>
      %124 = vector.shape_cast %123 : vector<1xf32> to vector<1x1x1xf32>
      %125 = vector.extract %124[0, 0, 0] : f32 from vector<1x1x1xf32>
      %c0_57 = arith.constant 0 : index
      %c0_58 = arith.constant 0 : index
      %126 = memref.load %arg11[%c0_57, %c0_58] : memref<1x1xf32, #tpu.memory_space<smem>>
      memref.store %125, %arg11[%c0_57, %c0_58] : memref<1x1xf32, #tpu.memory_space<smem>>
    } else {
    }
    return
  }
  func.func @transform_0(%arg0: i32) -> (i32, i32) {
    %c0_i32 = arith.constant 0 : i32
    %c0_i32_0 = arith.constant 0 : i32
    return %c0_i32, %arg0 : i32, i32
  }
  func.func @transform_1(%arg0: i32) -> (i32, i32) {
    %c0_i32 = arith.constant 0 : i32
    %c0_i32_0 = arith.constant 0 : i32
    return %c0_i32, %arg0 : i32, i32
  }
  func.func @transform_2(%arg0: i32) -> (i32, i32) {
    %c0_i32 = arith.constant 0 : i32
    %c0_i32_0 = arith.constant 0 : i32
    return %arg0, %c0_i32 : i32, i32
  }
  func.func @transform_3(%arg0: i32) -> (i32, i32) {
    %c0_i32 = arith.constant 0 : i32
    %c0_i32_0 = arith.constant 0 : i32
    %c0_i32_1 = arith.constant 0 : i32
    return %c0_i32, %c0_i32_0 : i32, i32
  }
  func.func @transform_4(%arg0: i32) -> (i32, i32) {
    %c0_i32 = arith.constant 0 : i32
    %c0_i32_0 = arith.constant 0 : i32
    %c0_i32_1 = arith.constant 0 : i32
    return %c0_i32, %c0_i32_0 : i32, i32
  }
  func.func @transform_5(%arg0: i32) -> (i32, i32) {
    %c0_i32 = arith.constant 0 : i32
    %c0_i32_0 = arith.constant 0 : i32
    %c0_i32_1 = arith.constant 0 : i32
    return %c0_i32, %c0_i32_0 : i32, i32
  }
  func.func @transform_6(%arg0: i32) -> (i32, i32) {
    %c0_i32 = arith.constant 0 : i32
    %c0_i32_0 = arith.constant 0 : i32
    %c0_i32_1 = arith.constant 0 : i32
    return %c0_i32, %c0_i32_0 : i32, i32
  }
  func.func @transform_7(%arg0: i32) -> (i32, i32) {
    %c0_i32 = arith.constant 0 : i32
    %c0_i32_0 = arith.constant 0 : i32
    %c0_i32_1 = arith.constant 0 : i32
    return %c0_i32, %c0_i32_0 : i32, i32
  }
  func.func @transform_8(%arg0: i32) -> (i32, i32) {
    %c0_i32 = arith.constant 0 : i32
    %c0_i32_0 = arith.constant 0 : i32
    %c0_i32_1 = arith.constant 0 : i32
    return %c0_i32, %c0_i32_0 : i32, i32
  }
  func.func @transform_9(%arg0: i32) -> (i32, i32) {
    %c0_i32 = arith.constant 0 : i32
    %c0_i32_0 = arith.constant 0 : i32
    %c0_i32_1 = arith.constant 0 : i32
    return %c0_i32, %c0_i32_0 : i32, i32
  }
  func.func @transform_10(%arg0: i32) -> (i32, i32) {
    %c0_i32 = arith.constant 0 : i32
    %c0_i32_0 = arith.constant 0 : i32
    %c0_i32_1 = arith.constant 0 : i32
    return %c0_i32, %c0_i32_0 : i32, i32
  }
}

</mosaic_0001>

<bundles_post_ra>
// kernel: tpu_custom_call.1
= control target key start
LH: loop header
LB: loop body
LE: loop exit
PB: predicated region body
PF: predicated region fallthrough
CT: control target
= control target key end

     0   :  { %s2712_s0 = inlined_call_operand.vmem [shape: bf16[8,1024], index: 0, kind: input, shape index: {}]   ;;  %s2713_s1 = inlined_call_operand.vmem [shape: bf16[8,1024], index: 1, kind: input, shape index: {}]   ;;  %s2714_s2 = inlined_call_operand.vmem [shape: bf16[1024,64], index: 2, kind: input, shape index: {}]   ;;  %s2715_s3 = inlined_call_operand.vmem [shape: f32[64,32], index: 3, kind: input, shape index: {}]   ;;  %s2716_s4 = inlined_call_operand.vmem [shape: f32[1,32], index: 4, kind: input, shape index: {}]   ;;  %s2717_s5 = inlined_call_operand.vmem [shape: f32[1,32], index: 5, kind: input, shape index: {}]   ;;  %s2718_s6 = inlined_call_operand.vmem [shape: f32[32,32], index: 6, kind: input, shape index: {}]   ;;  %s2719_s7 = inlined_call_operand.vmem [shape: f32[1,32], index: 7, kind: input, shape index: {}]   ;;  %s2720_s8 = inlined_call_operand.vmem [shape: f32[1,32], index: 8, kind: input, shape index: {}]   ;;  %s2721_s9 = inlined_call_operand.vmem [shape: f32[32,32], index: 9, kind: input, shape index: {}]   ;;  %s2722_s10 = inlined_call_operand.hbm [shape: f32[1,1], index: 10, kind: output, shape index: {}]  }
   0x1   :  { %v2139_v0 = vld [vmem:[%s2714_s2 + $0x40] sm:$0xff]   ;;  %v2162_v4 = vld [vmem:[%s2714_s2 + $0x48] sm:$0xff]   ;;  %v2186_v8 = vld [vmem:[%s2714_s2 + $0x50] sm:$0xff]  }
   0x2   :  { %v2144_v1 = vld [vmem:[%s2714_s2 + $0xc0] sm:$0xff]   ;;  %1685 = vmatprep.subr.bf16.mxu0 %v2139_v0  ;;  %v2168_v5 = vld [vmem:[%s2714_s2 + $0xc8] sm:$0xff]   ;;  %v2192_v9 = vld [vmem:[%s2714_s2 + $0xd0] sm:$0xff]  }
   0x3   :  { %v2150_v2 = vld [vmem:[%s2714_s2] sm:$0xff]   ;;  %1707 = vmatprep.subr.bf16.mxu1 %v2144_v1  ;;  %v2174_v6 = vld [vmem:[%s2714_s2 + $0x8] sm:$0xff]   ;;  %v2198_v10 = vld [vmem:[%s2714_s2 + $0x10] sm:$0xff]  }
   0x4   :  { %v2156_v3 = vld [vmem:[%s2714_s2 + $0x80] sm:$0xff]   ;;  %1686 = vmatpush3.bf16.msra.mxu0 %v2150_v2  ;;  %v2180_v7 = vld [vmem:[%s2714_s2 + $0x88] sm:$0xff]   ;;  %v2204_v11 = vld [vmem:[%s2714_s2 + $0x90] sm:$0xff]  }
   0x5   :  { %1708 = vmatpush3.bf16.msra.mxu1 %v2156_v3  ;;  %1687 = vmatprep.subr.bf16.mxu0 %v2162_v4  ;;  %v2210_v12 = vld [vmem:[%s2714_s2 + $0x58] sm:$0xff]   ;;  %v2234_v16 = vld [vmem:[%s2714_s2 + $0x60] sm:$0xff]   ;;  %v2258_v20 = vld [vmem:[%s2714_s2 + $0x68] sm:$0xff]  }
   0x6   :  { %1709 = vmatprep.subr.bf16.mxu1 %v2168_v5  ;;  %v2216_v13 = vld [vmem:[%s2714_s2 + $0xd8] sm:$0xff]   ;;  %v2240_v17 = vld [vmem:[%s2714_s2 + $0xe0] sm:$0xff]   ;;  %v2264_v21 = vld [vmem:[%s2714_s2 + $0xe8] sm:$0xff]  }
   0x7   :  { %v2222_v14 = vld [vmem:[%s2714_s2 + $0x18] sm:$0xff]   ;;  %v2246_v18 = vld [vmem:[%s2714_s2 + $0x20] sm:$0xff]   ;;  %v2270_v22 = vld [vmem:[%s2714_s2 + $0x28] sm:$0xff]  }
   0x8   :  { %1688 = vmatpush3.bf16.msra.mxu0 %v2174_v6  ;;  %v2228_v15 = vld [vmem:[%s2714_s2 + $0x98] sm:$0xff]   ;;  %v2252_v19 = vld [vmem:[%s2714_s2 + $0xa0] sm:$0xff]   ;;  %v2276_v23 = vld [vmem:[%s2714_s2 + $0xa8] sm:$0xff]  }
   0x9   :  { %1710 = vmatpush3.bf16.msra.mxu1 %v2180_v7  ;;  %1689 = vmatprep.subr.bf16.mxu0 %v2186_v8  ;;  %v2282_v24 = vld [vmem:[%s2714_s2 + $0x70] sm:$0xff]   ;;  %v2306_v28 = vld [vmem:[%s2714_s2 + $0x78] sm:$0xff]   ;;  %v44_v32 = vld [vmem:[%s2712_s0] sm:$0xff] }
   0xa   :  { %1711 = vmatprep.subr.bf16.mxu1 %v2192_v9  ;;  %v2288_v25 = vld [vmem:[%s2714_s2 + $0xf0] sm:$0xff]   ;;  %v2312_v29 = vld [vmem:[%s2714_s2 + $0xf8] sm:$0xff]   ;;  %v45_v33 = vld [vmem:[%s2712_s0 + $0x8] sm:$0xff]  ;;  %v1587_v34 = vcombine.low %v44_v32, %v44_v32  ;;  %v1588_v35 = vcombine.high %v44_v32, %v44_v32 }
   0xb   :  { %v2294_v26 = vld [vmem:[%s2714_s2 + $0x30] sm:$0xff]   ;;  %v2318_v30 = vld [vmem:[%s2714_s2 + $0x38] sm:$0xff]   ;;  %v1589_v36 = vcombine.low %v45_v33, %v45_v33  ;;  %v1590_v37 = vcombine.high %v45_v33, %v45_v33  ;;  %v2337_v38 = vld [vmem:[%s2714_s2 + $0x140] sm:$0xff]  }
   0xc   :  { %1690 = vmatpush3.bf16.msra.mxu0 %v2198_v10  ;;  %v2300_v27 = vld [vmem:[%s2714_s2 + $0xb0] sm:$0xff]   ;;  %v2324_v31 = vld [vmem:[%s2714_s2 + $0xb8] sm:$0xff]   ;;  %v2342_v39 = vld [vmem:[%s2714_s2 + $0x1c0] sm:$0xff]   ;;  %625 = vmatprep.mubr.bf16.mxu0 %v1588_v35 }
   0xd   :  { %1712 = vmatpush3.bf16.msra.mxu1 %v2204_v11  ;;  %1691 = vmatprep.subr.bf16.mxu0 %v2210_v12  ;;  %v2347_v40 = vld [vmem:[%s2714_s2 + $0x100] sm:$0xff]   ;;  %v2359_v42 = vld [vmem:[%s2714_s2 + $0x148] sm:$0xff]   ;;  %v2383_v46 = vld [vmem:[%s2714_s2 + $0x150] sm:$0xff]  }
   0xe   :  { %1713 = vmatprep.subr.bf16.mxu1 %v2216_v13  ;;  %665 = vmatprep.mubr.bf16.mxu1 %v1590_v37  ;;  %v2352_v41 = vld [vmem:[%s2714_s2 + $0x180] sm:$0xff]   ;;  %v2366_v43 = vld [vmem:[%s2714_s2 + $0x1c8] sm:$0xff]   ;;  %v2390_v47 = vld [vmem:[%s2714_s2 + $0x1d0] sm:$0xff]  }
   0xf   :  { %v2372_v44 = vld [vmem:[%s2714_s2 + $0x108] sm:$0xff]   ;;  %v2396_v48 = vld [vmem:[%s2714_s2 + $0x110] sm:$0xff]   ;;  %v2407_v50 = vld [vmem:[%s2714_s2 + $0x158] sm:$0xff]  }
  0x10   :  { %1692 = vmatpush3.bf16.msra.mxu0 %v2222_v14  ;;  %v2378_v45 = vld [vmem:[%s2714_s2 + $0x188] sm:$0xff]   ;;  %v2402_v49 = vld [vmem:[%s2714_s2 + $0x190] sm:$0xff]   ;;  %v2414_v51 = vld [vmem:[%s2714_s2 + $0x1d8] sm:$0xff]  }
  0x11   :  { %1714 = vmatpush3.bf16.msra.mxu1 %v2228_v15  ;;  %1693 = vmatprep.subr.bf16.mxu0 %v2234_v16  ;;  %v2420_v52 = vld [vmem:[%s2714_s2 + $0x118] sm:$0xff]   ;;  %v2431_v54 = vld [vmem:[%s2714_s2 + $0x160] sm:$0xff]   ;;  %v2455_v58 = vld [vmem:[%s2714_s2 + $0x168] sm:$0xff]  }
  0x12   :  { %1715 = vmatprep.subr.bf16.mxu1 %v2240_v17  ;;  %v2426_v53 = vld [vmem:[%s2714_s2 + $0x198] sm:$0xff]   ;;  %v2438_v55 = vld [vmem:[%s2714_s2 + $0x1e0] sm:$0xff]   ;;  %v2462_v59 = vld [vmem:[%s2714_s2 + $0x1e8] sm:$0xff]  }
  0x13   :  { %v2444_v56 = vld [vmem:[%s2714_s2 + $0x120] sm:$0xff]   ;;  %2732 = vst [vmem:[#allocation6_spill] sm:$0xff] %v2462_v59  ;;  %v2468_v60 = vld [vmem:[%s2714_s2 + $0x128] sm:$0xff]   ;;  %v2479_v62 = vld [vmem:[%s2714_s2 + $0x170] sm:$0xff]  }
  0x14   :  { %1694 = vmatpush3.bf16.msra.mxu0 %v2246_v18  ;;  %v2450_v57 = vld [vmem:[%s2714_s2 + $0x1a0] sm:$0xff]   ;;  %2733 = vst [vmem:[#allocation7_spill] sm:$0xff] %v2468_v60  ;;  %v2474_v61 = vld [vmem:[%s2714_s2 + $0x1a8] sm:$0xff]   ;;  %2735 = vst [vmem:[#allocation9_spill] sm:$0xff] %v2479_v62 }
  0x15   :  { %1716 = vmatpush3.bf16.msra.mxu1 %v2252_v19  ;;  %1695 = vmatprep.subr.bf16.mxu0 %v2258_v20  ;;  %2734 = vst [vmem:[#allocation8_spill] sm:$0xff] %v2474_v61  ;;  %v2486_v63 = vld [vmem:[%s2714_s2 + $0x1f0] sm:$0xff]   ;;  %v2510_v35 = vld [vmem:[%s2714_s2 + $0x1f8] sm:$0xff]  }
  0x16   :  { %1717 = vmatprep.subr.bf16.mxu1 %v2264_v21  ;;  %2736 = vst [vmem:[#allocation10_spill] sm:$0xff] %v2486_v63  ;;  %v2492_v32 = vld [vmem:[%s2714_s2 + $0x130] sm:$0xff]   ;;  %2740 = vst [vmem:[#allocation14_spill] sm:$0xff] %v2510_v35  ;;  %v2522_v37 = vld [vmem:[%s2714_s2 + $0x1b8] sm:$0xff]  }
  0x17   :  { %2737 = vst [vmem:[#allocation11_spill] sm:$0xff] %v2492_v32  ;;  %v2498_v33 = vld [vmem:[%s2714_s2 + $0x1b0] sm:$0xff]  }
  0x18   :  { %1696 = vmatpush3.bf16.msra.mxu0 %v2270_v22  ;;  %2738 = vst [vmem:[#allocation12_spill] sm:$0xff] %v2498_v33 }
  0x19   :  { %1718 = vmatpush3.bf16.msra.mxu1 %v2276_v23  ;;  %1697 = vmatprep.subr.bf16.mxu0 %v2282_v24 }
  0x1a   :  { %1719 = vmatprep.subr.bf16.mxu1 %v2288_v25 }
  0x1c   :  { %1698 = vmatpush3.bf16.msra.mxu0 %v2294_v26 }
  0x1d   :  { %1720 = vmatpush3.bf16.msra.mxu1 %v2300_v27  ;;  %1699 = vmatprep.subr.bf16.mxu0 %v2306_v28 }
  0x1e   :  { %1721 = vmatprep.subr.bf16.mxu1 %v2312_v29 }
  0x20   :  { %1700 = vmatpush3.bf16.msra.mxu0 %v2318_v30 }
  0x21   :  { %1722 = vmatpush3.bf16.msra.mxu1 %v2324_v31  ;;  %1729 = vmatprep.subr.bf16.mxu0 %v2337_v38 }
  0x22   :  { %1751 = vmatprep.subr.bf16.mxu1 %v2342_v39 }
  0x23   :  { %626 = vmatmul.mubr.bf16.vlgmr.msra.gmra.mrb[0].mxu0 %v1587_v34  ;;  %v2503_v34 = vld [vmem:[%s2714_s2 + $0x178] sm:$0xff]  }
  0x24   :  { %666 = vmatmul.mubr.bf16.vlgmr.msra.gmra.mrb[0].mxu1 %v1589_v36  ;;  %1730 = vmatpush3.bf16.msra.mxu0 %v2347_v40  ;;  %2739 = vst [vmem:[#allocation13_spill] sm:$0xff] %v2503_v34  ;;  %v2516_v36 = vld [vmem:[%s2714_s2 + $0x138] sm:$0xff]  }
  0x25   :  { %1752 = vmatpush3.bf16.msra.mxu1 %v2352_v41  ;;  %1731 = vmatprep.subr.bf16.mxu0 %v2359_v42 }
  0x26   :  { %1753 = vmatprep.subr.bf16.mxu1 %v2366_v43 }
  0x28   :  { %1732 = vmatpush3.bf16.msra.mxu0 %v2372_v44 }
  0x29   :  { %1754 = vmatpush3.bf16.msra.mxu1 %v2378_v45  ;;  %1733 = vmatprep.subr.bf16.mxu0 %v2383_v46 }
  0x2a   :  { %1755 = vmatprep.subr.bf16.mxu1 %v2390_v47 }
  0x2c   :  { %1734 = vmatpush3.bf16.msra.mxu0 %v2396_v48 }
  0x2d   :  { %1756 = vmatpush3.bf16.msra.mxu1 %v2402_v49  ;;  %1735 = vmatprep.subr.bf16.mxu0 %v2407_v50 }
  0x2e   :  { %1757 = vmatprep.subr.bf16.mxu1 %v2414_v51 }
  0x30   :  { %1736 = vmatpush3.bf16.msra.mxu0 %v2420_v52 }
  0x31   :  { %1758 = vmatpush3.bf16.msra.mxu1 %v2426_v53  ;;  %1737 = vmatprep.subr.bf16.mxu0 %v2431_v54 }
  0x32   :  { %1759 = vmatprep.subr.bf16.mxu1 %v2438_v55 }
  0x34   :  { %1738 = vmatpush3.bf16.msra.mxu0 %v2444_v56 }
  0x35   :  { %1760 = vmatpush3.bf16.msra.mxu1 %v2450_v57  ;;  %1739 = vmatprep.subr.bf16.mxu0 %v2455_v58 }
  0x36   :  { %1761 = vmatprep.subr.bf16.mxu1 %v2462_v59 }
  0x38   :  { %1740 = vmatpush3.bf16.msra.mxu0 %v2468_v60 }
  0x39   :  { %1762 = vmatpush3.bf16.msra.mxu1 %v2474_v61  ;;  %1741 = vmatprep.subr.bf16.mxu0 %v2479_v62  ;;  %v48_v62 = vld [vmem:[%s2713_s1] sm:$0xff] }
  0x3a   :  { %1763 = vmatprep.subr.bf16.mxu1 %v2486_v63 }
  0x3c   :  { %1742 = vmatpush3.bf16.msra.mxu0 %v2492_v32 }
  0x3d   :  { %1764 = vmatpush3.bf16.msra.mxu1 %v2498_v33  ;;  %1743 = vmatprep.subr.bf16.mxu0 %v2503_v34  ;;  %v46_v33 = vld [vmem:[%s2712_s0 + $0x10] sm:$0xff]  ;;  %v47_v34 = vld [vmem:[%s2712_s0 + $0x18] sm:$0xff] }
  0x3e   :  { %1765 = vmatprep.subr.bf16.mxu1 %v2510_v35  ;;  %v1591_v32 = vcombine.low %v46_v33, %v46_v33  ;;  %v1592_v63 = vcombine.high %v46_v33, %v46_v33  ;;  %v49_v35 = vld [vmem:[%s2713_s1 + $0x8] sm:$0xff]  ;;  %v1593_v61 = vcombine.low %v47_v34, %v47_v34  ;;  %v1594_v60 = vcombine.high %v47_v34, %v47_v34 }
  0x40   :  { %1744 = vmatpush3.bf16.msra.mxu0 %v2516_v36 }
  0x41   :  { %1766 = vmatpush3.bf16.msra.mxu1 %v2522_v37 }
  0x42   :  { %15 = vsyncpa [#allocation4], 0  ;;  %705 = vmatprep.mubr.bf16.mxu0 %v1592_v63  ;;  %1773 = vmatprep.subr.bf16.mxu0 %v2139_v0  ;;  %v1660_v33 = vcombine.high %v48_v62, %v48_v62  ;;  %v1662_v59 = vcombine.high %v49_v35, %v49_v35  ;;  %v1659_v0 = vcombine.low %v48_v62, %v48_v62  ;;  %vm41_vm0 = vcmask 523264   ;;  %s2067_s27 = scalar_lea.hbm %s2722_s10, 16 }
  0x43   :  { %745 = vmatprep.mubr.bf16.mxu1 %v1594_v60  ;;  %1795 = vmatprep.subr.bf16.mxu1 %v2144_v1  ;;  %v1661_v1 = vcombine.low %v49_v35, %v49_v35  ;;  %vm1043_vm1 = vcmask 261120   ;;  %vm1411_vm2 = vcmask 64512   ;;  %p2068_p0 = scmp.ne.s32.totalorder %s2722_s10, %s2067_s27  ;;  %p2071_p1 = scmp.lt.u32.totalorder %s2067_s27, %s2722_s10 }
  0x44   :  { %706 = vmatmul.mubr.bf16.vlgmr.msra.gmra.mrb[4].mxu0 %v1591_v32  ;;  %746 = vmatmul.mubr.bf16.vlgmr.msra.gmra.mrb[4].mxu1 %v1593_v61 }
  0x45   :  { %1774 = vmatpush3.bf16.msra.mxu0 %v2150_v2  ;;  %1796 = vmatpush3.bf16.msra.mxu1 %v2156_v3  ;;  %v50_v2 = vld [vmem:[%s2713_s1 + $0x10] sm:$0xff]  ;;  %v51_v3 = vld [vmem:[%s2713_s1 + $0x18] sm:$0xff]  ;;  %p2073_p2 = pnand %p2071_p1, %p2068_p0 }
  0x46   :  { %1775 = vmatprep.subr.bf16.mxu0 %v2162_v4  ;;  %1797 = vmatprep.subr.bf16.mxu1 %v2168_v5  ;;  %v1664_v4 = vcombine.high %v50_v2, %v50_v2  ;;  %v1666_v5 = vcombine.high %v51_v3, %v51_v3 }
  0x47   :  { %817 = vmatprep.mubr.bf16.mxu0 %v1660_v33  ;;  %857 = vmatprep.mubr.bf16.mxu1 %v1662_v59 }
  0x49   :  { %1776 = vmatpush3.bf16.msra.mxu0 %v2174_v6  ;;  %1798 = vmatpush3.bf16.msra.mxu1 %v2180_v7  ;;  %v2741_v6 = vld [vmem:[#allocation6_spill] sm:$0xff]  ;;  %v2742_v7 = vld [vmem:[#allocation7_spill] sm:$0xff] }
  0x4a   :  { %1777 = vmatprep.subr.bf16.mxu0 %v2186_v8  ;;  %1799 = vmatprep.subr.bf16.mxu1 %v2192_v9  ;;  %v2743_v8 = vld [vmem:[#allocation8_spill] sm:$0xff]  ;;  %v2744_v9 = vld [vmem:[#allocation9_spill] sm:$0xff] }
  0x4d   :  { %1778 = vmatpush3.bf16.msra.mxu0 %v2198_v10  ;;  %1800 = vmatpush3.bf16.msra.mxu1 %v2204_v11  ;;  %v2745_v10 = vld [vmem:[#allocation10_spill] sm:$0xff]  ;;  %v2746_v11 = vld [vmem:[#allocation11_spill] sm:$0xff] }
  0x4e   :  { %1779 = vmatprep.subr.bf16.mxu0 %v2210_v12  ;;  %1801 = vmatprep.subr.bf16.mxu1 %v2216_v13  ;;  %v2747_v12 = vld [vmem:[#allocation12_spill] sm:$0xff]  ;;  %v2748_v13 = vld [vmem:[#allocation13_spill] sm:$0xff] }
  0x51   :  { %1780 = vmatpush3.bf16.msra.mxu0 %v2222_v14  ;;  %1802 = vmatpush3.bf16.msra.mxu1 %v2228_v15  ;;  %v2749_v14 = vld [vmem:[#allocation14_spill] sm:$0xff]  ;;  %v1663_v15 = vcombine.low %v50_v2, %v50_v2 }
  0x52   :  { %1781 = vmatprep.subr.bf16.mxu0 %v2234_v16  ;;  %1803 = vmatprep.subr.bf16.mxu1 %v2240_v17  ;;  %v1665_v16 = vcombine.low %v51_v3, %v51_v3  ;;  %v2079_v17 = vmov 0.0  }
  0x53   :  { %42 = vst.msk [vmem:[#allocation2] sm:$0xff] %vm41_vm0, %v2079_v17  ;;  %43 = vst.msk [vmem:[#allocation2 + $0x8] sm:$0xff] %vm41_vm0, %v2079_v17 }
  0x55   :  { %1782 = vmatpush3.bf16.msra.mxu0 %v2246_v18  ;;  %1804 = vmatpush3.bf16.msra.mxu1 %v2252_v19  ;;  %v952_v18 = vld [vmem:[%s2715_s3] sm:$0xff]  ;;  %v953_v19 = vld [vmem:[%s2715_s3 + $0x8] sm:$0xff] }
  0x56   :  { %1783 = vmatprep.subr.bf16.mxu0 %v2258_v20  ;;  %1805 = vmatprep.subr.bf16.mxu1 %v2264_v21  ;;  %v1937_v20 = vpack.c.bf16 %v953_v19, %v952_v18  ;;  %v954_v21 = vld [vmem:[%s2715_s3 + $0x10] sm:$0xff]  ;;  %v1105_v19 = vld [vmem:[%s2718_s6] sm:$0xff] }
  0x59   :  { %1784 = vmatpush3.bf16.msra.mxu0 %v2270_v22  ;;  %1806 = vmatpush3.bf16.msra.mxu1 %v2276_v23  ;;  %v955_v22 = vld [vmem:[%s2715_s3 + $0x18] sm:$0xff] }
  0x5a   :  { %1785 = vmatprep.subr.bf16.mxu0 %v2282_v24  ;;  %1807 = vmatprep.subr.bf16.mxu1 %v2288_v25  ;;  %v1941_v23 = vpack.c.bf16 %v955_v22, %v954_v21  ;;  %v956_v24 = vld [vmem:[%s2715_s3 + $0x20] sm:$0xff]  ;;  %v957_v25 = vld [vmem:[%s2715_s3 + $0x28] sm:$0xff]  ;;  %v1107_v22 = vld [vmem:[%s2718_s6 + $0x10] sm:$0xff] }
  0x5d   :  { %1786 = vmatpush3.bf16.msra.mxu0 %v2294_v26  ;;  %1808 = vmatpush3.bf16.msra.mxu1 %v2300_v27  ;;  %v1945_v26 = vpack.c.bf16 %v957_v25, %v956_v24  ;;  %v958_v27 = vld [vmem:[%s2715_s3 + $0x30] sm:$0xff] }
  0x5e   :  { %1787 = vmatprep.subr.bf16.mxu0 %v2306_v28  ;;  %1809 = vmatprep.subr.bf16.mxu1 %v2312_v29  ;;  %v959_v28 = vld [vmem:[%s2715_s3 + $0x38] sm:$0xff] }
  0x5f   :  { %v1949_v29 = vpack.c.bf16 %v959_v28, %v958_v27 }
  0x61   :  { %1788 = vmatpush3.bf16.msra.mxu0 %v2318_v30  ;;  %1810 = vmatpush3.bf16.msra.mxu1 %v2324_v31 }
  0x62   :  { %1817 = vmatprep.subr.bf16.mxu0 %v2337_v38  ;;  %1839 = vmatprep.subr.bf16.mxu1 %v2342_v39 }
  0x64   :  { %818 = vmatmul.mubr.bf16.vlgmr.msra.gmra.mrb[8].mxu0 %v1659_v0  ;;  %858 = vmatmul.mubr.bf16.vlgmr.msra.gmra.mrb[8].mxu1 %v1661_v1 }
  0x65   :  { %1818 = vmatpush3.bf16.msra.mxu0 %v2347_v40  ;;  %1840 = vmatpush3.bf16.msra.mxu1 %v2352_v41 }
  0x66   :  { %1819 = vmatprep.subr.bf16.mxu0 %v2359_v42  ;;  %1841 = vmatprep.subr.bf16.mxu1 %v2366_v43 }
  0x67   :  { %897 = vmatprep.mubr.bf16.mxu0 %v1664_v4  ;;  %937 = vmatprep.mubr.bf16.mxu1 %v1666_v5 }
  0x69   :  { %1820 = vmatpush3.bf16.msra.mxu0 %v2372_v44  ;;  %1842 = vmatpush3.bf16.msra.mxu1 %v2378_v45 }
  0x6a   :  { %1821 = vmatprep.subr.bf16.mxu0 %v2383_v46  ;;  %1843 = vmatprep.subr.bf16.mxu1 %v2390_v47 }
  0x6d   :  { %1822 = vmatpush3.bf16.msra.mxu0 %v2396_v48  ;;  %1844 = vmatpush3.bf16.msra.mxu1 %v2402_v49 }
  0x6e   :  { %1823 = vmatprep.subr.bf16.mxu0 %v2407_v50  ;;  %1845 = vmatprep.subr.bf16.mxu1 %v2414_v51 }
  0x71   :  { %1824 = vmatpush3.bf16.msra.mxu0 %v2420_v52  ;;  %1846 = vmatpush3.bf16.msra.mxu1 %v2426_v53 }
  0x72   :  { %1825 = vmatprep.subr.bf16.mxu0 %v2431_v54  ;;  %1847 = vmatprep.subr.bf16.mxu1 %v2438_v55 }
  0x75   :  { %1826 = vmatpush3.bf16.msra.mxu0 %v2444_v56  ;;  %1848 = vmatpush3.bf16.msra.mxu1 %v2450_v57 }
  0x76   :  { %1827 = vmatprep.subr.bf16.mxu0 %v2455_v58  ;;  %1849 = vmatprep.subr.bf16.mxu1 %v2741_v6  ;;  %v180_v58 = vld [vmem:[#allocation2] sm:$0xff] }
  0x79   :  { %1828 = vmatpush3.bf16.msra.mxu0 %v2742_v7  ;;  %1850 = vmatpush3.bf16.msra.mxu1 %v2743_v8 }
  0x7a   :  { %1829 = vmatprep.subr.bf16.mxu0 %v2744_v9  ;;  %1851 = vmatprep.subr.bf16.mxu1 %v2745_v10 }
  0x7d   :  { %1830 = vmatpush3.bf16.msra.mxu0 %v2746_v11  ;;  %1852 = vmatpush3.bf16.msra.mxu1 %v2747_v12 }
  0x7e   :  { %1831 = vmatprep.subr.bf16.mxu0 %v2748_v13  ;;  %1853 = vmatprep.subr.bf16.mxu1 %v2749_v14  ;;  %v756_v14 = vld [vmem:[#allocation2 + $0x8] sm:$0xff] }
  0x81   :  { %1832 = vmatpush3.bf16.msra.mxu0 %v2516_v36  ;;  %1854 = vmatpush3.bf16.msra.mxu1 %v2522_v37 }
  0x82   :  { %1938 = vmatprep.subr.bf16.mxu0 %v1937_v20 }
  0x84   :  { %898 = vmatmul.mubr.bf16.vlgmr.msra.gmra.mrb[12].mxu0 %v1663_v15  ;;  %938 = vmatmul.mubr.bf16.vlgmr.msra.gmra.mrb[12].mxu1 %v1665_v16 }
  0x85   :  { %1940 = vmatpush3.bf16.msra.mxu0 %v1937_v20  ;;  %v1106_v20 = vld [vmem:[%s2718_s6 + $0x8] sm:$0xff] }
  0x86   :  { %1942 = vmatprep.subr.bf16.mxu0 %v1941_v23  ;;  %v1953_v21 = vpack.c.bf16 %v1106_v20, %v1105_v19 }
  0x88   :  { %1954 = vmatprep.subr.bf16.mxu1 %v1953_v21 }
  0x89   :  { %1944 = vmatpush3.bf16.msra.mxu0 %v1941_v23  ;;  %1956 = vmatpush3.bf16.msra.mxu1 %v1953_v21  ;;  %v1108_v23 = vld [vmem:[%s2718_s6 + $0x18] sm:$0xff] }
  0x8a   :  { %1946 = vmatprep.subr.bf16.mxu0 %v1945_v26  ;;  %v1957_v24 = vpack.c.bf16 %v1108_v23, %v1107_v22 }
  0x8c   :  { %1958 = vmatprep.subr.bf16.mxu1 %v1957_v24 }
  0x8d   :  { %1948 = vmatpush3.bf16.msra.mxu0 %v1945_v26  ;;  %1960 = vmatpush3.bf16.msra.mxu1 %v1957_v24 }
  0x8e   :  { %1950 = vmatprep.subr.bf16.mxu0 %v1949_v29 }
  0x91   :  { %1952 = vmatpush3.bf16.msra.mxu0 %v1949_v29 }
  0xf6   :  { %v1701_v30 = vpop.f32.mrb[0].mxu0 }
  0xf7   :  { %v1723_v31 = vpop.f32.mrb[0].mxu1  ;;  %v1702_v38 = vpop.f32.mrb[1].mxu0 }
  0xf8   :  { %v1724_v39 = vpop.f32.mrb[1].mxu1  ;;  %v1703_v40 = vadd.f32 %v1702_v38, %v1701_v30  ;;  %v1704_v42 = vpop.f32.mrb[2].mxu0 }
  0xf9   :  { %v1725_v41 = vadd.f32 %v1724_v39, %v1723_v31  ;;  %v1726_v43 = vpop.f32.mrb[2].mxu1  ;;  %v1705_v44 = vpop.f32.mrb[3].mxu0 }
  0xfa   :  { %v1727_v45 = vpop.f32.mrb[3].mxu1 }
  0xfb   :  { %v668_v46 = vadd.f32 %v1725_v41, %v1703_v40 }
 0x117   :  { %v1745_v47 = vpop.f32.mrb[4].mxu0  ;;  %v1767_v48 = vpop.f32.mrb[4].mxu1 }
 0x118   :  { %v1746_v49 = vpop.f32.mrb[5].mxu0  ;;  %v1768_v50 = vpop.f32.mrb[5].mxu1 }
 0x119   :  { %v1747_v51 = vadd.f32 %v1746_v49, %v1745_v47  ;;  %v1769_v52 = vadd.f32 %v1768_v50, %v1767_v48  ;;  %v1748_v53 = vpop.f32.mrb[6].mxu0  ;;  %v1770_v54 = vpop.f32.mrb[6].mxu1 }
 0x11a   :  { %v1749_v55 = vpop.f32.mrb[7].mxu0  ;;  %v1771_v56 = vpop.f32.mrb[7].mxu1 }
 0x11b   :  { %v708_v57 = vadd.f32 %v1747_v51, %v668_v46 }
 0x11d   :  { %v748_v59 = vadd.f32 %v1769_v52, %v708_v57 }
 0x11f   :  { %v753_v60 = vadd.f32 %v748_v59, %v180_v58 }
 0x121   :  { %755 = vst.msk [vmem:[#allocation2] sm:$0xff] %vm41_vm0, %v753_v60 }
 0x128   :  { %v950_v61 = vld [vmem:[#allocation2] sm:$0xff] }
 0x129   :  { %1904 = vmatprep.mubr.msk.f32.mxu0 %vm41_vm0, %v950_v61 }
 0x137   :  { %v1789_v62 = vpop.f32.mrb[8].mxu0  ;;  %v1811_v63 = vpop.f32.mrb[8].mxu1 }
 0x138   :  { %v1790_v32 = vpop.f32.mrb[9].mxu0  ;;  %v1812_v34 = vpop.f32.mrb[9].mxu1 }
 0x139   :  { %v1791_v35 = vadd.f32 %v1790_v32, %v1789_v62  ;;  %v1813_v36 = vadd.f32 %v1812_v34, %v1811_v63  ;;  %v1792_v37 = vpop.f32.mrb[10].mxu0  ;;  %v1814_v33 = vpop.f32.mrb[10].mxu1 }
 0x13a   :  { %v1793_v0 = vpop.f32.mrb[11].mxu0  ;;  %v1815_v1 = vpop.f32.mrb[11].mxu1 }
 0x13b   :  { %v860_v2 = vadd.f32 %v1813_v36, %v1791_v35 }
 0x157   :  { %v1833_v3 = vpop.f32.mrb[12].mxu0  ;;  %v1855_v4 = vpop.f32.mrb[12].mxu1 }
 0x158   :  { %v1834_v5 = vpop.f32.mrb[13].mxu0  ;;  %v1856_v6 = vpop.f32.mrb[13].mxu1 }
 0x159   :  { %v1835_v7 = vadd.f32 %v1834_v5, %v1833_v3  ;;  %v1857_v8 = vadd.f32 %v1856_v6, %v1855_v4  ;;  %v1836_v9 = vpop.f32.mrb[14].mxu0  ;;  %v1858_v10 = vpop.f32.mrb[14].mxu1  ;;  %v1670_v5 = vld [vmem:[%s2717_s5] ss:$0 sm:$0xff] }
 0x15a   :  { %v1837_v11 = vpop.f32.mrb[15].mxu0  ;;  %v1859_v12 = vpop.f32.mrb[15].mxu1 }
 0x15b   :  { %v900_v13 = vadd.f32 %v1835_v7, %v860_v2  ;;  %v1669_v2 = vld [vmem:[%s2716_s4] ss:$0 sm:$0xff] }
 0x15d   :  { %v940_v15 = vadd.f32 %v1857_v8, %v900_v13  ;;  %v1252_v13 = vld [vmem:[%s2721_s9] sm:$0xff] }
 0x15f   :  { %v945_v16 = vadd.f32 %v940_v15, %v756_v14  ;;  %v1253_v14 = vld [vmem:[%s2721_s9 + $0x8] sm:$0xff] }
 0x160   :  { %v1961_v15 = vpack.c.bf16 %v1253_v14, %v1252_v13 }
 0x161   :  { %946 = vst.msk [vmem:[#allocation2 + $0x8] sm:$0xff] %vm41_vm0, %v945_v16  ;;  %v1254_v16 = vld [vmem:[%s2721_s9 + $0x10] sm:$0xff] }
 0x162   :  { %1962 = vmatprep.subr.bf16.mxu1 %v1961_v15 }
 0x168   :  { %v951_v18 = vld [vmem:[#allocation2 + $0x8] sm:$0xff] }
 0x169   :  { %1905 = vmatmul.mubr.msk.f32.vlgmr.msra.gmra.mrb[16].mxu0 %vm41_vm0, %v951_v18  ;;  %v1255_v18 = vld [vmem:[%s2721_s9 + $0x18] sm:$0xff] }
 0x16a   :  { %v1965_v19 = vpack.c.bf16 %v1255_v18, %v1254_v16 }
 0x23c   :  { %v1906_v25 = vpop.f32.mrb[16].mxu0 }
 0x23d   :  { %v1051_v26 = vsel %vm1043_vm1, %v1906_v25, 0.0  ;;  %v1032_v27 = vpop.f32.mrb[17].mxu0 }
 0x23e   :  { %v1052_v28 = vrot.slane %v1051_v26, 4  ;;  %v1044_v29 = vsel %vm1043_vm1, %v1032_v27, 0.0 }
 0x23f   :  { %v1045_v30 = vrot.slane %v1044_v29, 4 }
 0x240   :  { %v1053_v31 = vadd.f32 %v1052_v28, %v1051_v26 }
 0x241   :  { %v1046_v38 = vadd.f32 %v1045_v30, %v1044_v29 }
 0x242   :  { %v1054_v39 = vrot.slane %v1053_v31, 2 }
 0x243   :  { %v1047_v40 = vrot.slane %v1046_v38, 2 }
 0x244   :  { %v1055_v41 = vadd.f32 %v1054_v39, %v1053_v31 }
 0x245   :  { %v1048_v42 = vadd.f32 %v1047_v40, %v1046_v38 }
 0x246   :  { %v1056_v43 = vrot.slane %v1055_v41, 1 }
 0x247   :  { %v1049_v44 = vrot.slane %v1048_v42, 1 }
 0x248   :  { %v1057_v45 = vadd.f32 %v1056_v43, %v1055_v41 }
 0x249   :  { %v1050_v46 = vadd.f32 %v1049_v44, %v1048_v42 }
 0x24a   :  { %v1060_v47 = vmul.f32 0.125, %v1057_v45 }
 0x24b   :  { %v1059_v48 = vmul.f32 0.125, %v1050_v46 }
 0x24c   :  { %v1062_v49 = vsub.f32 %v1906_v25, %v1060_v47 }
 0x24d   :  { %v1061_v50 = vsub.f32 %v1032_v27, %v1059_v48 }
 0x24e   :  { %v1064_v51 = vmul.f32 %v1062_v49, %v1062_v49 }
 0x24f   :  { %v1063_v52 = vmul.f32 %v1061_v50, %v1061_v50 }
 0x250   :  { %v1072_v53 = vsel %vm1043_vm1, %v1064_v51, 0.0 }
 0x251   :  { %v1073_v54 = vrot.slane %v1072_v53, 4  ;;  %v1065_v55 = vsel %vm1043_vm1, %v1063_v52, 0.0 }
 0x252   :  { %v1066_v56 = vrot.slane %v1065_v55, 4 }
 0x253   :  { %v1074_v57 = vadd.f32 %v1073_v54, %v1072_v53 }
 0x254   :  { %v1067_v58 = vadd.f32 %v1066_v56, %v1065_v55 }
 0x255   :  { %v1075_v59 = vrot.slane %v1074_v57, 2 }
 0x256   :  { %v1068_v60 = vrot.slane %v1067_v58, 2 }
 0x257   :  { %v1076_v61 = vadd.f32 %v1075_v59, %v1074_v57 }
 0x258   :  { %v1069_v62 = vadd.f32 %v1068_v60, %v1067_v58 }
 0x259   :  { %v1077_v63 = vrot.slane %v1076_v61, 1 }
 0x25a   :  { %v1070_v32 = vrot.slane %v1069_v62, 1 }
 0x25b   :  { %v1078_v34 = vadd.f32 %v1077_v63, %v1076_v61 }
 0x25c   :  { %v1071_v35 = vadd.f32 %v1070_v32, %v1069_v62 }
 0x25d   :  { %v1080_v36 = vmul.f32 0.125, %v1078_v34 }
 0x25e   :  { %v1079_v37 = vmul.f32 0.125, %v1071_v35 }
 0x25f   :  { %v1082_v33 = vadd.f32 1e-05, %v1080_v36  ;;  %v1673_v36 = vld [vmem:[%s2719_s7] ss:$0 sm:$0xff] }
 0x260   :  { %v1081_v0 = vadd.f32 1e-05, %v1079_v37 }
 0x261   :  { %2055 = vrsqrt.f32 %v1082_v33 }
 0x262   :  { %2057 = vrsqrt.f32 %v1081_v0  ;;  %v1674_v0 = vld [vmem:[%s2720_s8] ss:$0 sm:$0xff] }
 0x26b   :  { %v2056_v1 = vpop.eup %2055 }
 0x26c   :  { %v2058_v3 = vpop.eup %2057  ;;  %v1086_v4 = vmul.f32 %v2056_v1, %v1062_v49 }
 0x26d   :  { %v1085_v6 = vmul.f32 %v2058_v3, %v1061_v50 }
 0x26e   :  { %v1094_v7 = vmul.f32 %v1669_v2, %v1086_v4 }
 0x26f   :  { %v1093_v8 = vmul.f32 %v1669_v2, %v1085_v6 }
 0x270   :  { %v1102_v9 = vadd.f32 %v1670_v5, %v1094_v7 }
 0x271   :  { %v1101_v10 = vadd.f32 %v1670_v5, %v1093_v8 }
 0x272   :  { %v1104_v12 = vmax.f32 %v1102_v9, 0.0 }
 0x273   :  { %v1103_v11 = vmax.f32 %v1101_v10, 0.0 }
 0x275   :  { %1915 = vmatprep.mubr.msk.f32.mxu1 %vm1043_vm1, %v1103_v11 }
 0x276   :  { %1916 = vmatmul.mubr.msk.f32.vlgmr.msra.gmra.mrb[16].mxu1 %vm1043_vm1, %v1104_v12 }
 0x277   :  { %1964 = vmatpush3.bf16.msra.mxu1 %v1961_v15 }
 0x278   :  { %1966 = vmatprep.subr.bf16.mxu1 %v1965_v19 }
 0x27b   :  { %1968 = vmatpush3.bf16.msra.mxu1 %v1965_v19 }
 0x349   :  { %v1917_v20 = vpop.f32.mrb[16].mxu1 }
 0x34a   :  { %v1199_v21 = vsel %vm1043_vm1, %v1917_v20, 0.0  ;;  %v1181_v22 = vpop.f32.mrb[17].mxu1 }
 0x34b   :  { %v1200_v23 = vrot.slane %v1199_v21, 4  ;;  %v1192_v24 = vsel %vm1043_vm1, %v1181_v22, 0.0 }
 0x34c   :  { %v1193_v25 = vrot.slane %v1192_v24, 4 }
 0x34d   :  { %v1201_v26 = vadd.f32 %v1200_v23, %v1199_v21 }
 0x34e   :  { %v1194_v27 = vadd.f32 %v1193_v25, %v1192_v24 }
 0x34f   :  { %v1202_v28 = vrot.slane %v1201_v26, 2 }
 0x350   :  { %v1195_v29 = vrot.slane %v1194_v27, 2 }
 0x351   :  { %v1203_v30 = vadd.f32 %v1202_v28, %v1201_v26 }
 0x352   :  { %v1196_v31 = vadd.f32 %v1195_v29, %v1194_v27 }
 0x353   :  { %v1204_v38 = vrot.slane %v1203_v30, 1 }
 0x354   :  { %v1197_v39 = vrot.slane %v1196_v31, 1 }
 0x355   :  { %v1205_v40 = vadd.f32 %v1204_v38, %v1203_v30 }
 0x356   :  { %v1198_v41 = vadd.f32 %v1197_v39, %v1196_v31 }
 0x357   :  { %v1207_v42 = vmul.f32 0.125, %v1205_v40 }
 0x358   :  { %v1206_v43 = vmul.f32 0.125, %v1198_v41 }
 0x359   :  { %v1209_v44 = vsub.f32 %v1917_v20, %v1207_v42 }
 0x35a   :  { %v1208_v45 = vsub.f32 %v1181_v22, %v1206_v43 }
 0x35b   :  { %v1211_v46 = vmul.f32 %v1209_v44, %v1209_v44 }
 0x35c   :  { %v1210_v47 = vmul.f32 %v1208_v45, %v1208_v45 }
 0x35d   :  { %v1219_v48 = vsel %vm1043_vm1, %v1211_v46, 0.0 }
 0x35e   :  { %v1220_v49 = vrot.slane %v1219_v48, 4  ;;  %v1212_v50 = vsel %vm1043_vm1, %v1210_v47, 0.0 }
 0x35f   :  { %v1213_v51 = vrot.slane %v1212_v50, 4 }
 0x360   :  { %v1221_v52 = vadd.f32 %v1220_v49, %v1219_v48 }
 0x361   :  { %v1214_v53 = vadd.f32 %v1213_v51, %v1212_v50 }
 0x362   :  { %v1222_v54 = vrot.slane %v1221_v52, 2 }
 0x363   :  { %v1215_v55 = vrot.slane %v1214_v53, 2 }
 0x364   :  { %v1223_v56 = vadd.f32 %v1222_v54, %v1221_v52 }
 0x365   :  { %v1216_v57 = vadd.f32 %v1215_v55, %v1214_v53 }
 0x366   :  { %v1224_v58 = vrot.slane %v1223_v56, 1 }
 0x367   :  { %v1217_v59 = vrot.slane %v1216_v57, 1 }
 0x368   :  { %v1225_v60 = vadd.f32 %v1224_v58, %v1223_v56 }
 0x369   :  { %v1218_v61 = vadd.f32 %v1217_v59, %v1216_v57 }
 0x36a   :  { %v1227_v62 = vmul.f32 0.125, %v1225_v60 }
 0x36b   :  { %v1226_v63 = vmul.f32 0.125, %v1218_v61 }
 0x36c   :  { %v1229_v32 = vadd.f32 1e-05, %v1227_v62 }
 0x36d   :  { %v1228_v34 = vadd.f32 1e-05, %v1226_v63  ;;  %v1513_v63 = vlaneseq }
 0x36e   :  { %2059 = vrsqrt.f32 %v1229_v32 }
 0x36f   :  { %2061 = vrsqrt.f32 %v1228_v34  ;;  %v1514_v32 = vshrl.u32 %v1513_v63, 7 }
 0x371   :  { %v1515_v34 = vadd.s32 8, %v1514_v32 }
 0x378   :  { %v2060_v35 = vpop.eup %2059 }
 0x379   :  { %v2062_v37 = vpop.eup %2061  ;;  %v1233_v33 = vmul.f32 %v2060_v35, %v1209_v44  ;;  %v1519_v35 = vand.u32 127, %v1513_v63 }
 0x37a   :  { %v1232_v1 = vmul.f32 %v2062_v37, %v1208_v45 }
 0x37b   :  { %v1241_v2 = vmul.f32 %v1673_v36, %v1233_v33  ;;  %vm1521_vm3 = vcmp.eq.s32.totalorder %v1515_v34, %v1519_v35  ;;  %vm1520_vm4 = vcmp.eq.s32.totalorder %v1514_v32, %v1519_v35  ;;  %v1517_v33 = vadd.s32 24, %v1514_v32 }
 0x37c   :  { %v1240_v3 = vmul.f32 %v1673_v36, %v1232_v1  ;;  %v1682_v36 = vsel %vm1521_vm3, 1.0, %v2079_v17  ;;  %v1681_v37 = vsel %vm1520_vm4, 1.0, %v2079_v17 }
 0x37d   :  { %v1249_v4 = vadd.f32 %v1674_v0, %v1241_v2  ;;  %v1533_v1 = vsub.f32 1.0, %v1682_v36  ;;  %v1532_v2 = vsub.f32 1.0, %v1681_v37  ;;  %vm1523_vm5 = vcmp.eq.s32.totalorder %v1517_v33, %v1519_v35 }
 0x37e   :  { %v1248_v5 = vadd.f32 %v1674_v0, %v1240_v3  ;;  %v1516_v0 = vadd.s32 16, %v1514_v32 }
 0x37f   :  { %v1251_v7 = vmax.f32 %v1249_v4, 0.0  ;;  %v1537_v3 = vmul.f32 0.005, %v1533_v1 }
 0x380   :  { %v1250_v6 = vmax.f32 %v1248_v5, 0.0  ;;  %vm1522_vm6 = vcmp.eq.s32.totalorder %v1516_v0, %v1519_v35  ;;  %v1536_v5 = vmul.f32 0.005, %v1532_v2 }
 0x382   :  { %1926 = vmatprep.mubr.msk.f32.mxu1 %vm1043_vm1, %v1250_v6 }
 0x383   :  { %1927 = vmatmul.mubr.msk.f32.vlgmr.msra.gmra.mrb[18].mxu1 %vm1043_vm1, %v1251_v7 }
 0x456   :  { %v1928_v8 = vpop.f32.mrb[18].mxu1 }
 0x457   :  { %v1344_v9 = vsel %vm1043_vm1, %v1928_v8, 0.0  ;;  %v1328_v10 = vpop.f32.mrb[19].mxu1 }
 0x458   :  { %v1345_v11 = vrot.slane %v1344_v9, 4  ;;  %v1337_v12 = vsel %vm1043_vm1, %v1328_v10, 0.0 }
 0x459   :  { %v1338_v13 = vrot.slane %v1337_v12, 4 }
 0x45a   :  { %v1346_v14 = vadd.f32 %v1345_v11, %v1344_v9  ;;  %v1683_v9 = vsel %vm1522_vm6, 1.0, %v2079_v17  ;;  %v1541_v11 = vadd.f32 %v1682_v36, %v1537_v3 }
 0x45b   :  { %v1339_v15 = vadd.f32 %v1338_v13, %v1337_v12  ;;  %v1540_v13 = vadd.f32 %v1681_v37, %v1536_v5 }
 0x45c   :  { %v1347_v16 = vrot.slane %v1346_v14, 2 }
 0x45d   :  { %v1340_v18 = vrot.slane %v1339_v15, 2 }
 0x45e   :  { %v1348_v19 = vadd.f32 %v1347_v16, %v1346_v14  ;;  %v1534_v16 = vsub.f32 1.0, %v1683_v9 }
 0x45f   :  { %v1341_v20 = vadd.f32 %v1340_v18, %v1339_v15 }
 0x460   :  { %v1349_v21 = vrot.slane %v1348_v19, 1 }
 0x461   :  { %v1342_v22 = vrot.slane %v1341_v20, 1 }
 0x462   :  { %v1350_v23 = vadd.f32 %v1349_v21, %v1348_v19 }
 0x463   :  { %v1343_v24 = vadd.f32 %v1342_v22, %v1341_v20 }
 0x464   :  { %v1352_v25 = vmul.f32 0.125, %v1350_v23 }
 0x465   :  { %v1351_v26 = vmul.f32 0.125, %v1343_v24  ;;  %v1538_v24 = vmul.f32 0.005, %v1534_v16 }
 0x466   :  { %v1354_v27 = vsub.f32 %v1928_v8, %v1352_v25  ;;  %v1684_v8 = vsel %vm1523_vm5, 1.0, %v2079_v17 }
 0x467   :  { %v1353_v28 = vsub.f32 %v1328_v10, %v1351_v26  ;;  %v1535_v15 = vsub.f32 1.0, %v1684_v8 }
 0x468   :  { %v1356_v29 = vmul.f32 %v1354_v27, %v1354_v27 }
 0x469   :  { %v1355_v30 = vmul.f32 %v1353_v28, %v1353_v28  ;;  %v1539_v23 = vmul.f32 0.005, %v1535_v15 }
 0x46a   :  { %v1364_v31 = vsel %vm1043_vm1, %v1356_v29, 0.0 }
 0x46b   :  { %v1365_v38 = vrot.slane %v1364_v31, 4  ;;  %v1357_v39 = vsel %vm1043_vm1, %v1355_v30, 0.0 }
 0x46c   :  { %v1358_v40 = vrot.slane %v1357_v39, 4 }
 0x46d   :  { %v1366_v41 = vadd.f32 %v1365_v38, %v1364_v31  ;;  %v1542_v31 = vadd.f32 %v1683_v9, %v1538_v24 }
 0x46e   :  { %v1359_v42 = vadd.f32 %v1358_v40, %v1357_v39  ;;  %v1543_v39 = vadd.f32 %v1684_v8, %v1539_v23 }
 0x46f   :  { %v1367_v43 = vrot.slane %v1366_v41, 2 }
 0x470   :  { %v1360_v44 = vrot.slane %v1359_v42, 2 }
 0x471   :  { %v1368_v45 = vadd.f32 %v1367_v43, %v1366_v41 }
 0x472   :  { %v1361_v46 = vadd.f32 %v1360_v44, %v1359_v42 }
 0x473   :  { %v1369_v47 = vrot.slane %v1368_v45, 1 }
 0x474   :  { %v1362_v48 = vrot.slane %v1361_v46, 1 }
 0x475   :  { %v1370_v49 = vadd.f32 %v1369_v47, %v1368_v45 }
 0x476   :  { %v1363_v50 = vadd.f32 %v1362_v48, %v1361_v46 }
 0x477   :  { %v1372_v51 = vmul.f32 0.125, %v1370_v49 }
 0x478   :  { %v1371_v52 = vmul.f32 0.125, %v1363_v50 }
 0x479   :  { %v1374_v53 = vadd.f32 1e-05, %v1372_v51 }
 0x47a   :  { %v1373_v54 = vadd.f32 1e-05, %v1371_v52 }
 0x47b   :  { %2063 = vrsqrt.f32 %v1374_v53 }
 0x47c   :  { %2065 = vrsqrt.f32 %v1373_v54 }
 0x485   :  { %v2064_v55 = vpop.eup %2063 }
 0x486   :  { %v2066_v56 = vpop.eup %2065  ;;  %v1378_v57 = vmul.f32 %v2064_v55, %v1354_v27 }
 0x487   :  { %v1377_v58 = vmul.f32 %v2066_v56, %v1353_v28 }
 0x488   :  { %1929 = vmatprep.subr.mxu0 %v1378_v57  ;;  %1969 = vmatprep.subr.mxu1 %v1378_v57 }
 0x489   :  { %1930 = vmatpush3.msra.mxu0 %v1378_v57  ;;  %1970 = vmatpush3.msra.mxu1 %v1378_v57 }
 0x48a   :  { %1379 = vxpose.xlu0.b32.start.end [1/1] (short) (narrow) %v1377_v58, 32 }
 0x50a   :  { %v1395_v59 = vpop.trf.xlu0 }
 0x50b   :  { %1931 = vmatprep.mubr.msk.f32.mxu0 %vm1411_vm2, %v1395_v59 }
 0x50e   :  { %v1396_v60 = vpop.trf.xlu0 }
 0x50f   :  { %1932 = vmatmul.mubr.msk.f32.vlgmr.msra.gmra.mrb[18].mxu0 %vm1411_vm2, %v1396_v60 }
 0x512   :  { %v1397_v61 = vpop.trf.xlu0 }
 0x513   :  { %1934 = vmatprep.mubr.msk.f32.mxu1 %vm1411_vm2, %v1397_v61 }
 0x516   :  { %v1398_v62 = vpop.trf.xlu0 }
 0x517   :  { %1935 = vmatmul.mubr.msk.f32.vlgmr.msra.gmra.mrb[20].mxu1 %vm1411_vm2, %v1398_v62 }
 0x5e2   :  { %v1933_v4 = vpop.f32.mrb[18].mxu0 }
 0x5e3   :  { %v1510_v6 = vmul.f32 0.125, %v1933_v4  ;;  %v1490_v7 = vpop.f32.mrb[19].mxu0 }
 0x5e4   :  { %v1509_v10 = vmul.f32 0.125, %v1490_v7 }
 0x5e5   :  { %v1545_v12 = vsub.f32 %v1510_v6, %v1682_v36 }
 0x5e6   :  { %v1544_v14 = vsub.f32 %v1509_v10, %v1681_v37 }
 0x5e7   :  { %v1549_v18 = vmul.f32 %v1545_v12, %v1545_v12 }
 0x5e8   :  { %v1548_v19 = vmul.f32 %v1544_v14, %v1544_v14 }
 0x5e9   :  { %v1553_v20 = vmul.f32 %v1549_v18, %v1541_v11 }
 0x5ea   :  { %v1552_v21 = vmul.f32 %v1548_v19, %v1540_v13  ;;  %v1936_v22 = vpop.f32.mrb[20].mxu1 }
 0x5eb   :  { %v1512_v25 = vmul.f32 0.125, %v1936_v22  ;;  %v1500_v26 = vpop.f32.mrb[21].mxu1  ;;  %v1557_v27 = vsel %vm1043_vm1, %v1553_v20, 0.0 }
 0x5ec   :  { %v1556_v17 = vsel %vm1043_vm1, %v1552_v21, 0.0  ;;  %v1511_v28 = vmul.f32 0.125, %v1500_v26 }
 0x5ed   :  { %v1547_v29 = vsub.f32 %v1512_v25, %v1684_v8  ;;  %v1558_v30 = vadd.f32 %v1557_v27, %v1556_v17 }
 0x5ee   :  { %v1546_v38 = vsub.f32 %v1511_v28, %v1683_v9 }
 0x5ef   :  { %v1551_v40 = vmul.f32 %v1547_v29, %v1547_v29 }
 0x5f0   :  { %v1550_v41 = vmul.f32 %v1546_v38, %v1546_v38 }
 0x5f1   :  { %v1555_v43 = vmul.f32 %v1551_v40, %v1543_v39 }
 0x5f2   :  { %v1554_v42 = vmul.f32 %v1550_v41, %v1542_v31 }
 0x5f3   :  { %v1561_v46 = vsel %vm1043_vm1, %v1555_v43, 0.0 }
 0x5f4   :  { %v1559_v44 = vsel %vm1043_vm1, %v1554_v42, 0.0 }
 0x5f5   :  { %v1560_v45 = vadd.f32 %v1559_v44, %v1558_v30 }
 0x5f7   :  { %v1562_v47 = vadd.f32 %v1561_v46, %v1560_v45 }
 0x5f9   :  { %1563 = vadd.xlane.f32.xlu0 %v1562_v47 }
 0x686   :  { %v1564_v48 = vpop.xlane.xlu0 %1563 }
 0x687   :  { %v1565_v49 = vrot.slane %v1564_v48, 4 }
 0x689   :  { %v1566_v50 = vadd.f32 %v1565_v49, %v1564_v48 }
 0x68b   :  { %v1567_v51 = vrot.slane %v1566_v50, 2 }
 0x68d   :  { %v1568_v52 = vadd.f32 %v1567_v51, %v1566_v50 }
 0x68f   :  { %v1569_v53 = vrot.slane %v1568_v52, 1 }
 0x691   :  { %v1570_v54 = vadd.f32 %v1569_v53, %v1568_v52 }
 0x693   :  { %1971 = vpush %v1570_v54 }
 0x6c4   :  { %s1972_s7 = spop %1971 }
 0x6c5   :  { %1573 = sst [smem:[#allocation3]] %s1972_s7 }
 0x6c6   :  { %2076 = shalt.err (!%p2073_p2)
}
 0x6c7   :  { %s2080_s11 = smov [#allocation3]  }
 0x6c8   :  { %1581 = dma.smem_to_hbm %s2080_s11, 16, %s2722_s10, [#allocation4]  }
 0x6c9   :  { %2077 = dma.done.wait [#allocation4], 16  }
 0x6ca   :  { %2078 = vsyncadd [#allocation4], 4294967280 }
 0x6cb   :  { %1585 = sfence }
 0x6cc   :  { %1586 = vsyncpa [#allocation4], 1 }

</bundles_post_ra>
